<compile_context>
chip_gen: v7x
topology: tpu7x:2x2x1
jax: 0.10.0
libtpu: 0.0.40
codegen_flags: <defaults>
</compile_context>

<pallas_src>
import functools
import math

import jax
import jax.numpy as jnp
from jax.experimental import pallas as pl
from jax.experimental.pallas import tpu as pltpu


# ----------------------------------------------------------------------------------
# Tile helpers
# ----------------------------------------------------------------------------------

def _pick_tile(dim, target, align):
    """Largest divisor of `dim` <= target that is a multiple of `align`, preferring
    256-multiples (2x256 MXU on v6e/v7x).  Falls back to the full dim (block == full
    array dim is always legal)."""
    if dim <= target:
        return dim
    for a in sorted({max(align, 256), align}, reverse=True):
        start = target - target % a
        for t in range(start, a - 1, -a):
            if dim % t == 0:
                return t
    # TODO(synk): pad awkward (prime-ish) dims up front + pl.cdiv grid with an
    # in-kernel bounds mask instead of this monolithic fallback.
    return dim


def _pick_seq_tile(T, target=512):
    """Sequence tile for attention.  Full T if small, else the largest 128-multiple
    divisor <= target (keeps the key-padding-mask block legal: last dim % 128 == 0
    or == full dim)."""
    if T <= target:
        return T
    for t in range(target - target % 128, 127, -128):
        if T % t == 0:
            return t
    return T


# ----------------------------------------------------------------------------------
# Tiled dense (matmul + bias + optional relu); bf16 operands, f32 accumulate
# ----------------------------------------------------------------------------------

def _dense_kernel(x_ref, w_ref, b_ref, o_ref, acc_ref, *, activation):
    @pl.when(pl.program_id(2) == 0)
    def _():
        acc_ref[...] = jnp.zeros_like(acc_ref)

    acc_ref[...] += jnp.dot(x_ref[...], w_ref[...],
                            preferred_element_type=jnp.float32)

    @pl.when(pl.program_id(2) == pl.num_programs(2) - 1)
    def _():
        y = acc_ref[...] + b_ref[...]
        if activation == "relu":
            y = jnp.maximum(y, 0.0)
        o_ref[...] = y.astype(o_ref.dtype)


def dense(x, w, b, activation=None, *, tm=256, tn=256, tk=512):
    """x: [M,K] bf16, w: [K,N] bf16, b: [N] f32 -> bf16 [M,N] (matmul+bias+relu?)."""
    M, K = x.shape
    _, N = w.shape
    tm = _pick_tile(M, tm, 8)
    tk = _pick_tile(K, tk, 128)
    tn = _pick_tile(N, tn, 128)
    grid = (M // tm, N // tn, K // tk)
    # NOTE(v5e): pipeline_mode=pl.Buffered(3) on the weight spec can hide the K-stream
    # weight DMA behind the MXU; left at the default double-buffering here.
    return pl.pallas_call(
        functools.partial(_dense_kernel, activation=activation),
        out_shape=jax.ShapeDtypeStruct((M, N), x.dtype),
        grid=grid,
        in_specs=[
            pl.BlockSpec((tm, tk), lambda i, j, k: (i, k)),
            pl.BlockSpec((tk, tn), lambda i, j, k: (k, j)),
            pl.BlockSpec((1, tn), lambda i, j, k: (0, j)),
        ],
        out_specs=pl.BlockSpec((tm, tn), lambda i, j, k: (i, j)),
        scratch_shapes=[pltpu.VMEM((tm, tn), jnp.float32)],
        compiler_params=pltpu.CompilerParams(
            dimension_semantics=("parallel", "parallel", "arbitrary")),
    )(x, w, b.reshape(1, N))


# ----------------------------------------------------------------------------------
# Fused dense + residual-add + LayerNorm (LN lives in the last-K epilogue; N whole)
# ----------------------------------------------------------------------------------

def _dense_add_ln_kernel(x_ref, w_ref, b_ref, r_ref, g_ref, bt_ref, o_ref, acc_ref,
                         *, eps):
    @pl.when(pl.program_id(1) == 0)
    def _():
        acc_ref[...] = jnp.zeros_like(acc_ref)

    acc_ref[...] += jnp.dot(x_ref[...], w_ref[...],
                            preferred_element_type=jnp.float32)

    @pl.when(pl.program_id(1) == pl.num_programs(1) - 1)
    def _():
        y = acc_ref[...] + b_ref[...] + r_ref[...].astype(jnp.float32)
        mean = jnp.mean(y, axis=-1, keepdims=True)
        var = jnp.mean((y - mean) ** 2, axis=-1, keepdims=True)
        yn = (y - mean) * jax.lax.rsqrt(var + eps)
        o_ref[...] = (yn * g_ref[...] + bt_ref[...]).astype(o_ref.dtype)


def dense_add_ln(x, w, b, resid, gamma, beta, eps=1e-5, *, tm=256, tk=512):
    """LayerNorm(resid + (x @ w + b)); x: [M,K], w: [K,N], resid: [M,N] -> bf16 [M,N].
    N is kept whole per output tile so the LN row reduction sits in the matmul epilogue
    (saves one full [M,N] HBM write+read per LayerNorm)."""
    M, K = x.shape
    _, N = w.shape
    tm = _pick_tile(M, tm, 8)
    tk = _pick_tile(K, tk, 128)
    grid = (M // tm, K // tk)
    return pl.pallas_call(
        functools.partial(_dense_add_ln_kernel, eps=eps),
        out_shape=jax.ShapeDtypeStruct((M, N), resid.dtype),
        grid=grid,
        in_specs=[
            pl.BlockSpec((tm, tk), lambda i, k: (i, k)),
            pl.BlockSpec((tk, N), lambda i, k: (k, 0)),
            pl.BlockSpec((1, N), lambda i, k: (0, 0)),
            pl.BlockSpec((tm, N), lambda i, k: (i, 0)),
            pl.BlockSpec((1, N), lambda i, k: (0, 0)),
            pl.BlockSpec((1, N), lambda i, k: (0, 0)),
        ],
        out_specs=pl.BlockSpec((tm, N), lambda i, k: (i, 0)),
        scratch_shapes=[pltpu.VMEM((tm, N), jnp.float32)],
        compiler_params=pltpu.CompilerParams(
            dimension_semantics=("parallel", "arbitrary")),
    )(x, w, b.reshape(1, N), resid, gamma.reshape(1, N), beta.reshape(1, N))


# ----------------------------------------------------------------------------------
# Flash-style multi-head attention: grid (B, Tq-tiles, Tk-tiles), online softmax
# ----------------------------------------------------------------------------------

def _attention_kernel(q_ref, k_ref, v_ref, mask_ref, o_ref,
                      m_sc, l_sc, acc_sc, *, n_head, causal):
    ki = pl.program_id(2)

    @pl.when(ki == 0)
    def _():
        m_sc[...] = jnp.full_like(m_sc, -1e30)
        l_sc[...] = jnp.zeros_like(l_sc)
        acc_sc[...] = jnp.zeros_like(acc_sc)

    q = q_ref[0]                       # (tq, D) bf16; 1/sqrt(Dh) folded into W_q
    k = k_ref[0]                       # (tk, D) bf16
    v = v_ref[0]                       # (tk, D) bf16
    key_mask = mask_ref[0]             # (1, tk) f32; 1.0 = attend, 0.0 = masked
    tq, D = q.shape
    tk = k.shape[0]
    Dh = D // n_head

    # Combined key-padding (+ causal) mask, built once and shared by all heads.
    ok = jnp.broadcast_to(key_mask > 0.0, (tq, tk))
    if causal:
        row = jax.lax.broadcasted_iota(jnp.int32, (tq, tk), 0) + pl.program_id(1) * tq
        col = jax.lax.broadcasted_iota(jnp.int32, (tq, tk), 1) + ki * tk
        ok = jnp.logical_and(ok, row >= col)

    # Small static unroll over heads; each head's stats / accumulator live in scratch.
    # TODO(synk): for long sequences with causal masking, skip k-tiles entirely in the
    # future of the q-tile.
    for h in range(n_head):
        sl = slice(h * Dh, (h + 1) * Dh)
        # q @ k^T via dot_general contracting last dims (no explicit transpose).
        s = jax.lax.dot_general(q[:, sl], k[:, sl], (((1,), (1,)), ((), ())),
                                preferred_element_type=jnp.float32)
        s = jnp.where(ok, s, -1e30)
        m_prev = m_sc[h]                                            # (tq, 1)
        m_new = jnp.maximum(m_prev, jnp.max(s, axis=-1, keepdims=True))
        alpha = jnp.exp(m_prev - m_new)
        p = jnp.where(ok, jnp.exp(s - m_new), 0.0)                  # fully-masked-safe
        l_sc[h] = alpha * l_sc[h] + jnp.sum(p, axis=-1, keepdims=True)
        acc_sc[:, sl] = alpha * acc_sc[:, sl] + jnp.dot(
            p.astype(v.dtype), v[:, sl], preferred_element_type=jnp.float32)
        m_sc[h] = m_new

    @pl.when(ki == pl.num_programs(2) - 1)
    def _():
        for h in range(n_head):
            sl = slice(h * Dh, (h + 1) * Dh)
            l = l_sc[h]
            inv = jnp.where(l > 0.0, 1.0 / l, 0.0)                  # exact divide
            o_ref[0, :, sl] = (acc_sc[:, sl] * inv).astype(o_ref.dtype)


def attention(q, k, v, key_mask, n_head, causal):
    """q: [B,Tq,D] bf16, k/v: [B,Tk,D] bf16, key_mask: [B,Tk] -> bf16 [B,Tq,D]."""
    B, Tq, D = q.shape
    _, Tk, _ = k.shape
    tq = _pick_seq_tile(Tq)
    tk = _pick_seq_tile(Tk)
    km = key_mask.astype(jnp.float32).reshape(B, 1, Tk)
    grid = (B, Tq // tq, Tk // tk)
    return pl.pallas_call(
        functools.partial(_attention_kernel, n_head=n_head, causal=causal),
        out_shape=jax.ShapeDtypeStruct((B, Tq, D), q.dtype),
        grid=grid,
        in_specs=[
            pl.BlockSpec((1, tq, D), lambda b, qi, ki: (b, qi, 0)),
            pl.BlockSpec((1, tk, D), lambda b, qi, ki: (b, ki, 0)),
            pl.BlockSpec((1, tk, D), lambda b, qi, ki: (b, ki, 0)),
            pl.BlockSpec((1, 1, tk), lambda b, qi, ki: (b, 0, ki)),
        ],
        out_specs=pl.BlockSpec((1, tq, D), lambda b, qi, ki: (b, qi, 0)),
        scratch_shapes=[
            pltpu.VMEM((n_head, tq, 1), jnp.float32),   # running max per head
            pltpu.VMEM((n_head, tq, 1), jnp.float32),   # running sum per head
            pltpu.VMEM((tq, D), jnp.float32),           # output accumulator
        ],
        compiler_params=pltpu.CompilerParams(
            dimension_semantics=("parallel", "parallel", "arbitrary")),
    )(q, k, v, km)


# ----------------------------------------------------------------------------------
# Generator: fused logits matmul + temperature-scaled log_softmax (logits stay in VMEM)
# ----------------------------------------------------------------------------------

def _generator_fused_kernel(x_ref, w_ref, b_ref, o_ref, acc_ref, *, inv_temp):
    @pl.when(pl.program_id(1) == 0)
    def _():
        acc_ref[...] = jnp.zeros_like(acc_ref)

    acc_ref[...] += jnp.dot(x_ref[...], w_ref[...],
                            preferred_element_type=jnp.float32)

    @pl.when(pl.program_id(1) == pl.num_programs(1) - 1)
    def _():
        z = (acc_ref[...] + b_ref[...]) * inv_temp
        z = z - jnp.max(z, axis=-1, keepdims=True)
        lse = jnp.log(jnp.sum(jnp.exp(z), axis=-1, keepdims=True))
        o_ref[...] = (z - lse).astype(o_ref.dtype)


def _logsoftmax_kernel(x_ref, o_ref, *, inv_temp):
    z = x_ref[...].astype(jnp.float32) * inv_temp
    z = z - jnp.max(z, axis=-1, keepdims=True)
    lse = jnp.log(jnp.sum(jnp.exp(z), axis=-1, keepdims=True))
    o_ref[...] = (z - lse).astype(o_ref.dtype)


def generator(x, w, b, temperature):
    """x: [M,D] bf16, w: [D,V] bf16, b: [V] f32 ->
    log_softmax((x @ w + b) / temperature), f32 [M,V]."""
    M, D = x.shape
    _, V = w.shape
    inv_temp = 1.0 / float(temperature)

    if V <= 2048:
        # Fused path: whole vocab in one lane-dense tile; logits never round-trip HBM.
        tm = _pick_tile(M, 256, 8)
        tk = _pick_tile(D, 512, 128)
        grid = (M // tm, D // tk)
        return pl.pallas_call(
            functools.partial(_generator_fused_kernel, inv_temp=inv_temp),
            out_shape=jax.ShapeDtypeStruct((M, V), jnp.float32),
            grid=grid,
            in_specs=[
                pl.BlockSpec((tm, tk), lambda i, k: (i, k)),
                pl.BlockSpec((tk, V), lambda i, k: (k, 0)),
                pl.BlockSpec((1, V), lambda i, k: (0, 0)),
            ],
            out_specs=pl.BlockSpec((tm, V), lambda i, k: (i, 0)),
            scratch_shapes=[pltpu.VMEM((tm, V), jnp.float32)],
            compiler_params=pltpu.CompilerParams(
                dimension_semantics=("parallel", "arbitrary")),
        )(x, w, b.reshape(1, V))

    # TODO(synk): replace this two-pass fallback with an online-LSE kernel (V as a
    # trailing "arbitrary" grid axis and per-row max/sum scratch) for very large vocabs.
    logits = dense(x, w, b)                                        # bf16 logits
    # Budget accounts for double buffering of both input and output blocks (~4x).
    tm = _pick_tile(M, max(8, min(512, (4 << 20) // max(V * 4 * 4, 1))), 8)
    return pl.pallas_call(
        functools.partial(_logsoftmax_kernel, inv_temp=inv_temp),
        out_shape=jax.ShapeDtypeStruct((M, V), jnp.float32),
        grid=(M // tm,),
        in_specs=[pl.BlockSpec((tm, V), lambda i: (i, 0))],
        out_specs=pl.BlockSpec((tm, V), lambda i: (i, 0)),
        compiler_params=pltpu.CompilerParams(
            dimension_semantics=("parallel",), vmem_limit_bytes=64 << 20),
    )(logits)


# ----------------------------------------------------------------------------------
# Model glue (plain JAX: embedding gather, reshapes, parameter handling)
# ----------------------------------------------------------------------------------

def sinusoidal_pe(max_len, d):
    pos = jnp.arange(max_len, dtype=jnp.float32)[:, None]
    i = jnp.arange(d, dtype=jnp.float32)[None, :]
    angle = pos / jnp.power(10000.0, (2.0 * jnp.floor(i / 2.0)) / d)
    return jnp.where(jnp.mod(jnp.arange(d), 2) == 0, jnp.sin(angle), jnp.cos(angle))


def decoder_block(p, x, enc_out, tgt_key_mask, src_key_mask, n_head):
    B, T, D = x.shape
    _, Ts, _ = enc_out.shape
    x2d = x.reshape(B * T, D)
    e2d = enc_out.reshape(B * Ts, D)

    # --- masked self-attention; o-proj + residual + post-LN fused in one kernel ---
    qkv = dense(x2d, p["self_attn"]["wqkv"], p["self_attn"]["bqkv"])  # fused QKV proj
    # NOTE: for 128-aligned D this split could be avoided by indexing the [B,T,3D]
    # view directly from the attention BlockSpecs; kept in plain JAX for small D.
    q, k, v = jnp.split(qkv, 3, axis=-1)
    a = attention(q.reshape(B, T, D), k.reshape(B, T, D), v.reshape(B, T, D),
                  tgt_key_mask, n_head, causal=True)
    x2d = dense_add_ln(a.reshape(B * T, D), p["self_attn"]["wo"], p["self_attn"]["bo"],
                       x2d, p["ln1_g"], p["ln1_b"])

    # --- cross-attention over encoder output ---------------------------------------
    qx = dense(x2d, p["cross_attn"]["wq"], p["cross_attn"]["bq"])
    kv = dense(e2d, p["cross_attn"]["wkv"], p["cross_attn"]["bkv"])   # fused K/V proj
    k, v = jnp.split(kv, 2, axis=-1)
    a = attention(qx.reshape(B, T, D), k.reshape(B, Ts, D), v.reshape(B, Ts, D),
                  src_key_mask, n_head, causal=False)
    x2d = dense_add_ln(a.reshape(B * T, D), p["cross_attn"]["wo"], p["cross_attn"]["bo"],
                       x2d, p["ln2_g"], p["ln2_b"])

    # --- position-wise feed-forward; w2 + residual + post-LN fused ------------------
    h = dense(x2d, p["w1"], p["b1"], activation="relu")
    x2d = dense_add_ln(h, p["w2"], p["b2"], x2d, p["ln3_g"], p["ln3_b"])
    return x2d.reshape(B, T, D)


def decoder_forward(params, cfg, x_tokens, enc_out, input_mask, target_mask=None):
    """x_tokens: [B, Tt] int32, enc_out: [B, Ts, D], input_mask: [B, Ts] bool."""
    assert input_mask is not None, "you should provide the input mask"
    B, Tt = x_tokens.shape
    _, Ts, D = enc_out.shape
    H = cfg["n_head"]

    if target_mask is None:
        target_mask = x_tokens != cfg["trg_pad_idx"]

    # Embedding: scaled token embedding + sinusoidal positional encoding (plain JAX
    # gather); activations carried in bf16 between kernels, math inside kernels is f32.
    x = params["tok_emb"][x_tokens] * math.sqrt(D) + params["pos_enc"][:Tt][None, :, :]
    x = x.astype(jnp.bfloat16)
    enc = enc_out.astype(jnp.bfloat16)

    for blk in params["blocks"]:
        x = decoder_block(blk, x, enc, target_mask, input_mask, H)

    out = generator(x.reshape(B * Tt, D), params["gen_w"], params["gen_b"],
                    cfg["decoder_output_softmax_temperature"])
    return out.reshape(B, Tt, -1)


# ----------------------------------------------------------------------------------
# Deterministic parameter init (weights pre-cast to bf16; attention scale folded in)
# ----------------------------------------------------------------------------------

def init_params(key, cfg):
    D, FF, V, H = cfg["n_embd"], cfg["n_ff"], cfg["trg_vocab_size"], cfg["n_head"]
    q_scale = 1.0 / math.sqrt(D // H)
    keys = iter(jax.random.split(key, 256))

    def w(shape, scale=0.02):
        return (scale * jax.random.normal(next(keys), shape)).astype(jnp.float32)

    def self_attn_params():
        wqkv = w((D, 3 * D)).at[:, :D].multiply(q_scale)   # fold 1/sqrt(Dh) into W_q
        return {"wqkv": wqkv.astype(jnp.bfloat16),
                "bqkv": jnp.zeros((3 * D,), jnp.float32),  # zero bias: nothing to fold
                "wo": w((D, D)).astype(jnp.bfloat16),
                "bo": jnp.zeros((D,), jnp.float32)}

    def cross_attn_params():
        return {"wq": (w((D, D)) * q_scale).astype(jnp.bfloat16),
                "bq": jnp.zeros((D,), jnp.float32),
                "wkv": w((D, 2 * D)).astype(jnp.bfloat16),
                "bkv": jnp.zeros((2 * D,), jnp.float32),
                "wo": w((D, D)).astype(jnp.bfloat16),
                "bo": jnp.zeros((D,), jnp.float32)}

    blocks = []
    for _ in range(cfg["n_decoder_block"]):
        blocks.append({
            "self_attn": self_attn_params(),
            "cross_attn": cross_attn_params(),
            "ln1_g": jnp.ones((D,), jnp.float32), "ln1_b": jnp.zeros((D,), jnp.float32),
            "ln2_g": jnp.ones((D,), jnp.float32), "ln2_b": jnp.zeros((D,), jnp.float32),
            "ln3_g": jnp.ones((D,), jnp.float32), "ln3_b": jnp.zeros((D,), jnp.float32),
            "w1": w((D, FF)).astype(jnp.bfloat16), "b1": jnp.zeros((FF,), jnp.float32),
            "w2": w((FF, D)).astype(jnp.bfloat16), "b2": jnp.zeros((D,), jnp.float32),
        })

    return {
        "tok_emb": w((V, D), scale=1.0),
        "pos_enc": sinusoidal_pe(cfg["max_len"], D),
        "blocks": blocks,
        "gen_w": w((D, V)).astype(jnp.bfloat16),
        "gen_b": jnp.zeros((V,), jnp.float32),
    }


# ----------------------------------------------------------------------------------
# Demo
# ----------------------------------------------------------------------------------

if __name__ == "__main__":
    cfg = {
        "n_embd": 32,
        "n_head": 4,
        "n_ff": 64,
        "n_decoder_block": 2,
        "trg_vocab_size": 64,
        "trg_pad_idx": 0,
        "src_pad_idx": 0,
        "max_len": 32,
        "decoder_output_softmax_temperature": 1.0,
    }
    B, Tt, Ts = 2, 8, 8

    root = jax.random.PRNGKey(0)
    k_par, k_tok, k_enc = jax.random.split(root, 3)

    params = init_params(k_par, cfg)

    x_tokens = jax.random.randint(k_tok, (B, Tt), 1, cfg["trg_vocab_size"], dtype=jnp.int32)
    x_tokens = x_tokens.at[1, -2:].set(cfg["trg_pad_idx"])            # some target padding
    enc_out = jax.random.normal(k_enc, (B, Ts, cfg["n_embd"]), dtype=jnp.float32)
    input_mask = jnp.ones((B, Ts), dtype=bool).at[1, -3:].set(False)  # some source padding

    out = decoder_forward(params, cfg, x_tokens, enc_out, input_mask)
    jax.block_until_ready(out)
    assert out.shape == (B, Tt, cfg["trg_vocab_size"])
    assert bool(jnp.all(jnp.isfinite(out)))
    print("KERNEL_OK")
</pallas_src>

<mosaic_0001>
module attributes {stable_mosaic.version = 11 : i64} {
  func.func @_dense_kernel(%arg0: i32, %arg1: i32, %arg2: i32, %arg3: memref<16x32xbf16, #tpu.memory_space<vmem>>, %arg4: memref<32x96xbf16, #tpu.memory_space<vmem>>, %arg5: memref<1x96xf32, #tpu.memory_space<vmem>>, %arg6: memref<16x96xbf16, #tpu.memory_space<vmem>>, %arg7: memref<16x96xf32, #tpu.memory_space<vmem>>) attributes {dimension_semantics = [#tpu.dimension_semantics<parallel>, #tpu.dimension_semantics<parallel>, #tpu.dimension_semantics<arbitrary>], iteration_bounds = array<i64: 1, 1, 1>, scalar_prefetch = 0 : i64, scratch_operands = 1 : i64, tpu.core_type = #tpu.core_type<tc>, window_params = [{transform_indices = @transform_0, window_bounds = array<i64: 16, 32>}, {transform_indices = @transform_1, window_bounds = array<i64: 32, 96>}, {transform_indices = @transform_2, window_bounds = array<i64: 1, 96>}, {transform_indices = @transform_3, window_bounds = array<i64: 16, 96>}]} {
    %c0_i32 = arith.constant 0 : i32
    %0 = arith.cmpi eq, %arg2, %c0_i32 : i32
    %1 = arith.extui %0 : i1 to i32
    %c0_i32_0 = arith.constant 0 : i32
    %2 = arith.cmpi ne, %1, %c0_i32_0 : i32
    scf.if %2 {
      %cst_10 = arith.constant 0.000000e+00 : f32
      %12 = vector.broadcast %cst_10 : f32 to vector<16x96xf32>
      %c0_11 = arith.constant 0 : index
      %c0_12 = arith.constant 0 : index
      %13 = vector.load %arg7[%c0_11, %c0_12] : memref<16x96xf32, #tpu.memory_space<vmem>>, vector<16x96xf32>
      tpu.vector_store %arg7[%c0_11, %c0_12], %12 {strides = array<i32>} : memref<16x96xf32, #tpu.memory_space<vmem>>, vector<16x96xf32>,
    } else {
    }
    %c0 = arith.constant 0 : index
    %c0_1 = arith.constant 0 : index
    %3 = vector.load %arg7[%c0, %c0_1] : memref<16x96xf32, #tpu.memory_space<vmem>>, vector<16x96xf32>
    %c0_2 = arith.constant 0 : index
    %c0_3 = arith.constant 0 : index
    %4 = vector.load %arg3[%c0_2, %c0_3] : memref<16x32xbf16, #tpu.memory_space<vmem>>, vector<16x32xbf16>
    %c0_4 = arith.constant 0 : index
    %c0_5 = arith.constant 0 : index
    %5 = vector.load %arg4[%c0_4, %c0_5] : memref<32x96xbf16, #tpu.memory_space<vmem>>, vector<32x96xbf16>
    %cst = arith.constant dense<0.000000e+00> : vector<16x96xf32>
    %6 = tpu.matmul %4, %5, %cst {dimension_numbers = #tpu.dot_dimension_numbers<[1], [0], [0], [1], [0, 0, 1, 1], [], []>} : vector<16x32xbf16>, vector<32x96xbf16>, vector<16x96xf32> -> vector<16x96xf32>
    %7 = arith.addf %3, %6 : vector<16x96xf32>
    %c0_6 = arith.constant 0 : index
    %c0_7 = arith.constant 0 : index
    %8 = vector.load %arg7[%c0_6, %c0_7] : memref<16x96xf32, #tpu.memory_space<vmem>>, vector<16x96xf32>
    tpu.vector_store %arg7[%c0_6, %c0_7], %7 {strides = array<i32>} : memref<16x96xf32, #tpu.memory_space<vmem>>, vector<16x96xf32>,
    %c0_i32_8 = arith.constant 0 : i32
    %9 = arith.cmpi eq, %arg2, %c0_i32_8 : i32
    %10 = arith.extui %9 : i1 to i32
    %c0_i32_9 = arith.constant 0 : i32
    %11 = arith.cmpi ne, %10, %c0_i32_9 : i32
    scf.if %11 {
      %c0_10 = arith.constant 0 : index
      %c0_11 = arith.constant 0 : index
      %12 = vector.load %arg7[%c0_10, %c0_11] : memref<16x96xf32, #tpu.memory_space<vmem>>, vector<16x96xf32>
      %c0_12 = arith.constant 0 : index
      %c0_13 = arith.constant 0 : index
      %13 = vector.load %arg5[%c0_12, %c0_13] : memref<1x96xf32, #tpu.memory_space<vmem>>, vector<1x96xf32>
      %14 = vector.broadcast %13 : vector<1x96xf32> to vector<16x96xf32>
      %15 = arith.addf %12, %14 : vector<16x96xf32>
      %16 = arith.truncf %15 : vector<16x96xf32> to vector<16x96xbf16>
      %c0_14 = arith.constant 0 : index
      %c0_15 = arith.constant 0 : index
      %17 = vector.load %arg6[%c0_14, %c0_15] : memref<16x96xbf16, #tpu.memory_space<vmem>>, vector<16x96xbf16>
      tpu.vector_store %arg6[%c0_14, %c0_15], %16 {strides = array<i32>} : memref<16x96xbf16, #tpu.memory_space<vmem>>, vector<16x96xbf16>,
    } else {
    }
    return
  }
  func.func @transform_0(%arg0: i32, %arg1: i32, %arg2: i32) -> (i32, i32) {
    %c0_i32 = arith.constant 0 : i32
    return %arg0, %arg2 : i32, i32
  }
  func.func @transform_1(%arg0: i32, %arg1: i32, %arg2: i32) -> (i32, i32) {
    %c0_i32 = arith.constant 0 : i32
    return %arg2, %arg1 : i32, i32
  }
  func.func @transform_2(%arg0: i32, %arg1: i32, %arg2: i32) -> (i32, i32) {
    %c0_i32 = arith.constant 0 : i32
    %c0_i32_0 = arith.constant 0 : i32
    return %c0_i32, %arg1 : i32, i32
  }
  func.func @transform_3(%arg0: i32, %arg1: i32, %arg2: i32) -> (i32, i32) {
    %c0_i32 = arith.constant 0 : i32
    return %arg0, %arg1 : i32, i32
  }
}

</mosaic_0001>

<bundles_post_ra>
// kernel: tpu_custom_call.1
= control target key start
LH: loop header
LB: loop body
LE: loop exit
PB: predicated region body
PF: predicated region fallthrough
CT: control target
= control target key end

     0   :  { %8 = vsyncpa [#allocation4], 0  ;;  %s350_s0 = inlined_call_operand.hbm [shape: bf16[16,32], index: 0, kind: input, shape index: {}]   ;;  %s351_s1 = inlined_call_operand.hbm [shape: bf16[32,96], index: 1, kind: input, shape index: {}]   ;;  %s352_s2 = inlined_call_operand.vmem [shape: f32[1,96], index: 2, kind: input, shape index: {}]   ;;  %s353_s3 = inlined_call_operand.hbm [shape: bf16[16,96], index: 3, kind: output, shape index: {}]  }
   0x1   :  { %9 = vsyncpa [#allocation7], 0 }
   0x2   :  { %10 = vsyncpa [#allocation5], 0  ;;  %s271_s12 = smov [#allocation3]   ;;  %s199_s16 = scalar_lea.hbm %s350_s0, 128 }
   0x3   :  { %s16_s13 = sshll.u32 %s271_s12, 4  ;;  %p200_p0 = scmp.ne.s32.totalorder %s350_s0, %s199_s16  ;;  %s17_s13 = int_to_ptr.vmem [resolvable:$true] %s16_s13 }
   0x4   :  { %p203_p1 = scmp.lt.u32.totalorder %s199_s16, %s350_s0 }
   0x6   :  { %p205_p2 = pnand %p203_p1, %p200_p0 }
   0x8   :  { %208 = shalt.err (!%p205_p2)
}
   0x9   :  { %s209_s21 = scalar_lea.vmem %s17_s13, 128  ;;  %p214_p4 = scmp.lt.s32.totalorder %s17_s13, %s17_s13 }
   0xa   :  { %p210_p3 = scmp.ne.s32.totalorder %s17_s13, %s209_s21  ;;  %p215_p5 = scmp.lt.s32.totalorder %s209_s21, %s209_s21 }
   0xc   :  { %p216_p6 = por %p215_p5, %p214_p4 }
   0xe   :  { %p217_p7 = pnand %p216_p6, %p210_p3 }
  0x10   :  { %220 = shalt.err (!%p217_p7)
}
  0x11   :  { %s272_s22 = smov 64   ;;  %s273_s23 = smov 4  }
  0x12   :  { %22 = dma.hbm_to_vmem [thread:$0]  %s350_s0, 128, %s17_s13, [#allocation4], %s272_s22, %s272_s22, %s273_s23  }
  0x13   :  { %s274_s26 = smov [#allocation6]   ;;  %s221_s30 = scalar_lea.hbm %s351_s1, 256 }
  0x14   :  { %s28_s27 = sshll.u32 %s274_s26, 4  ;;  %p222_p8 = scmp.ne.s32.totalorder %s351_s1, %s221_s30  ;;  %s29_s27 = int_to_ptr.vmem [resolvable:$true] %s28_s27 }
  0x15   :  { %p225_p9 = scmp.lt.u32.totalorder %s221_s30, %s351_s1 }
  0x17   :  { %p227_p10 = pnand %p225_p9, %p222_p8 }
  0x19   :  { %230 = shalt.err (!%p227_p10)
}
  0x1a   :  { %s231_s8 = scalar_lea.vmem %s29_s27, 256  ;;  %p236_p12 = scmp.lt.s32.totalorder %s29_s27, %s29_s27 }
  0x1b   :  { %p232_p11 = scmp.ne.s32.totalorder %s29_s27, %s231_s8  ;;  %p237_p13 = scmp.lt.s32.totalorder %s231_s8, %s231_s8 }
  0x1d   :  { %p238_p0 = por %p237_p13, %p236_p12 }
  0x1f   :  { %p239_p1 = pnand %p238_p0, %p232_p11 }
  0x21   :  { %242 = shalt.err (!%p239_p1)
}
  0x22   :  { %34 = dma.hbm_to_vmem [thread:$0]  %s351_s1, 256, %s29_s27, [#allocation7], %s272_s22, %s272_s22, %s273_s23  }
  0x23   :  { %265 = dma.done.wait [#allocation4], 128  }
  0x24   :  { %266 = vsyncadd [#allocation4], 4294967168 }
  0x25   :  { %267 = dma.done.wait [#allocation7], 256  }
  0x26   :  { %268 = vsyncadd [#allocation7], 4294967040  ;;  %vm48_vm0 = vcmask 785408   ;;  %v275_v0 = vmov 0.0   ;;  %vm276_vm1 = vmmov 0   ;;  %v196_v1 = vld [vmem:[#allocation6] sm:$0xff]  }
  0x27   :  { %49 = vst.msk [vmem:[#allocation2] sm:$0xff] %vm48_vm0, %v275_v0  ;;  %50 = vst.msk [vmem:[#allocation2 + $0x8] sm:$0xff] %vm48_vm0, %v275_v0  ;;  %181 = vmatprep.subr.bf16.mxu0 %v275_v0  ;;  %185 = vmatprep.mubr.msk.bf16.mxu0 %vm276_vm1, %v275_v0  ;;  %v197_v2 = vld [vmem:[#allocation6 + $0x8] sm:$0xff]   ;;  %v198_v3 = vld [vmem:[#allocation3] sm:$0xff]   ;;  %vm76_vm2 = vcmask 261120   ;;  %vm148_vm3 = vcmask 781312  }
  0x28   :  { %182 = vmatpush3.bf16.msra.mxu0 %v196_v1  ;;  %v173_v12 = vld [vmem:[%s352_s2] ss:$0 sm:$0xff]  ;;  %s277_s11 = smov [#allocation8]  }
  0x29   :  { %183 = vmatprep.subr.bf16.mxu0 %v275_v0  ;;  %s156_s12 = sshll.u32 %s277_s11, 4  ;;  %s157_s12 = int_to_ptr.vmem [resolvable:$true] %s156_s12 }
  0x2a   :  { %s243_s13 = scalar_lea.vmem %s157_s12, 128  ;;  %p248_p3 = scmp.lt.s32.totalorder %s157_s12, %s157_s12 }
  0x2b   :  { %p244_p2 = scmp.ne.s32.totalorder %s157_s12, %s243_s13  ;;  %p249_p4 = scmp.lt.s32.totalorder %s243_s13, %s243_s13 }
  0x2c   :  { %184 = vmatpush3.bf16.msra.mxu0 %v197_v2 }
  0x2d   :  { %p250_p5 = por %p249_p4, %p248_p3 }
  0x2e   :  { %v51_v4 = vld [vmem:[#allocation2] sm:$0xff]  ;;  %v52_v6 = vld [vmem:[#allocation2 + $0x8] sm:$0xff] }
  0x2f   :  { %186 = vmatmul.mubr.msk.bf16.vlgmr.msra.gmra.mrb[0].mxu0 %vm76_vm2, %v198_v3  ;;  %p251_p6 = pnand %p250_p5, %p244_p2 }
 0x102   :  { %v114_v5 = vpop.f32.mrb[0].mxu0 }
 0x103   :  { %v121_v7 = vadd.f32 %v114_v5, %v51_v4  ;;  %v187_v8 = vpop.f32.mrb[1].mxu0 }
 0x104   :  { %v117_v9 = vpop.f32.mrb[2].mxu0 }
 0x105   :  { %124 = vst.msk [vmem:[#allocation2] sm:$0xff] %vm48_vm0, %v121_v7  ;;  %v122_v10 = vadd.f32 %v117_v9, %v52_v6  ;;  %v188_v11 = vpop.f32.mrb[3].mxu0 }
 0x107   :  { %125 = vst.msk [vmem:[#allocation2 + $0x8] sm:$0xff] %vm48_vm0, %v122_v10 }
 0x10c   :  { %v129_v13 = vld [vmem:[#allocation2] sm:$0xff] }
 0x10d   :  { %v138_v14 = vadd.f32 %v173_v12, %v129_v13 }
 0x10e   :  { %v130_v15 = vld [vmem:[#allocation2 + $0x8] sm:$0xff] }
 0x10f   :  { %v139_v16 = vadd.f32 %v173_v12, %v130_v15  ;;  %v176_v17 = vpack.c.bf16 %v138_v14, %v138_v14 }
 0x111   :  { %v177_v18 = vpack.c.bf16 %v139_v16, %v139_v16  ;;  %149 = vst.msk [vmem:[#allocation8] sm:$0xf] %vm148_vm3, %v176_v17 }
 0x113   :  { %150 = vst.msk [vmem:[#allocation8 + $0x4] sm:$0xf] %vm148_vm3, %v177_v18 }
 0x114   :  { %254 = shalt.err (!%p251_p6)
}
 0x115   :  { %s255_s15 = scalar_lea.hbm %s353_s3, 128 }
 0x116   :  { %p256_p7 = scmp.ne.s32.totalorder %s353_s3, %s255_s15  ;;  %p259_p8 = scmp.lt.u32.totalorder %s255_s15, %s353_s3 }
 0x118   :  { %p261_p9 = pnand %p259_p8, %p256_p7 }
 0x11a   :  { %264 = shalt.err (!%p261_p9)
}
 0x11b   :  { %162 = dma.vmem_to_hbm [thread:$0]  %s157_s12, 128, %s353_s3, [#allocation5], %s272_s22, %s272_s22, %s273_s23  }
 0x11c   :  { %269 = dma.done.wait [#allocation5], 128  }
 0x11d   :  { %270 = vsyncadd [#allocation5], 4294967168 }
 0x11e   :  { %166 = vsyncpa [#allocation4], 1 }
 0x11f   :  { %167 = vsyncpa [#allocation7], 1 }
 0x120   :  { %168 = vsyncpa [#allocation5], 1 }

</bundles_post_ra>
